<compile_context>
chip_gen: v7x
topology: tpu7x:2x2x1
jax: 0.10.0
libtpu: 0.0.40
codegen_flags: <defaults>
</compile_context>

<pallas_src>
import jax
import jax.numpy as jnp
from jax.experimental import pallas as pl
from jax.experimental.pallas import tpu as pltpu


def _round_up(x: int, m: int) -> int:
    return ((x + m - 1) // m) * m


def _linear_kernel(x_ref, w_ref, c_ref, u_ref):
    """One batch tile: u = x @ w - c  (c = b @ w), f32 MXU accumulation."""
    u_ref[...] = (
        jnp.dot(x_ref[...], w_ref[...], preferred_element_type=jnp.float32)
        - c_ref[...]
    ).astype(u_ref.dtype)


def _choose_pack_factor(batch: int, d: int) -> int:
    """Pack k = 128/D batch rows per vreg row when D | 128 and k | B."""
    if d >= 128 or 128 % d != 0:
        return 1
    f = 128 // d
    while f > 1 and batch % f != 0:
        f //= 2
    return f


def _choose_batch_tile(n_rows: int, dp: int,
                       tile_budget_bytes: int = 8 * 1024 * 1024) -> int:
    """Row-tile sized from a VMEM budget; >=2 grid steps for large batches."""
    # Double-buffered x and u tiles: 2 arrays * 2 buffers * TB * Dp * 4 bytes.
    tb_budget = max(8, (tile_budget_bytes // (16 * dp)) // 8 * 8)
    if n_rows <= 8:
        return n_rows                       # single full block (block == array dim)
    two_step = _round_up(-(-n_rows // 2), 8)  # >=2 steps -> v7x megacore sharding
    return max(8, min(tb_budget, two_step))


def linear_layer_init_direct(inputs, tri1, tri2, b):
    """Pallas forward pass (mode='direct').

    inputs: [B, D]; tri1, tri2: [D, D]; b: [D]
    returns: (u [B, D] f32, log_det [1] f32)
    """
    B, D = inputs.shape
    f32 = jnp.float32

    # One-time tiny D x D work in the wrapper (exact reference association).
    w = jnp.dot(tri1.astype(f32), tri2.astype(f32), preferred_element_type=f32)
    c = jnp.dot(b.astype(f32), w, preferred_element_type=f32)        # b @ w, (D,)

    # Lane densification: pack k rows per vreg row when possible.
    k = _choose_pack_factor(B, D)
    Dp, NR = D * k, B // k
    x_p = inputs.reshape(NR, Dp)            # contiguous row-major -> free reshape
    if k > 1:
        w_p = jnp.kron(jnp.eye(k, dtype=f32), w)    # blockdiag(w,...,w): (Dp, Dp)
        c_p = jnp.tile(c, k).reshape(1, Dp)
    else:
        w_p = w
        c_p = c.reshape(1, D)

    TB = _choose_batch_tile(NR, Dp)
    grid = (pl.cdiv(NR, TB),)

    u_p = pl.pallas_call(
        _linear_kernel,
        out_shape=jax.ShapeDtypeStruct((NR, Dp), f32),
        grid=grid,
        in_specs=[
            pl.BlockSpec((TB, Dp), lambda i: (i, 0)),   # x: streamed over batch
            pl.BlockSpec((Dp, Dp), lambda i: (0, 0)),   # packed w: resident
            pl.BlockSpec((1, Dp), lambda i: (0, 0)),    # packed c = b @ w: resident
        ],
        out_specs=pl.BlockSpec((TB, Dp), lambda i: (i, 0)),
        compiler_params=pltpu.CompilerParams(
            dimension_semantics=("parallel",),
            vmem_limit_bytes=32 * 1024 * 1024,
        ),
    )(x_p, w_p, c_p)

    u = u_p.reshape(B, D)

    # log_det: scalar O(D) reduction -> wrapper-side (overlaps the pallas_call).
    d1 = jnp.diagonal(tri1)
    d2 = jnp.diagonal(tri2)
    log_det = jnp.sum(jnp.log(jnp.abs(d1 * d2) + 1e-5), axis=-1, keepdims=True)

    # TODO(synk): mode='inverse' (torch.inverse of tri1 @ tri2) is not implemented
    # as a Pallas kernel; only the 'direct' forward path is translated.
    return u, log_det.astype(f32)


def _reference(inputs, tri1, tri2, b):
    w = tri1 @ tri2
    u = (inputs - b) @ w
    log_det = jnp.sum(
        jnp.log(jnp.abs(jnp.diag(tri1) * jnp.diag(tri2)) + 1e-5),
        axis=-1, keepdims=True,
    )
    return u, log_det


if __name__ == "__main__":
    key = jax.random.PRNGKey(0)
    D = 32  # num_inputs
    k_w, k_b, k_x = jax.random.split(key, 3)

    # Deterministic parameter init mirroring LinearLayer_init.__init__:
    #   W_T = W.T ; L, U = lu(W_T, permute_l=True) ; tri1 = L, tri2 = U
    W = jax.random.normal(k_w, (D, D), dtype=jnp.float32)
    L, U = jax.scipy.linalg.lu(W.T, permute_l=True)
    tri1 = jnp.asarray(L, dtype=jnp.float32)
    tri2 = jnp.asarray(U, dtype=jnp.float32)
    b = 0.1 * jax.random.normal(k_b, (D,), dtype=jnp.float32)

    fwd = jax.jit(linear_layer_init_direct)

    # B=8: packed (k=4, Dp=128) single full block.
    # B=13: unpacked path, 2 grid steps with a partial boundary block.
    # B=40: packed path, 2 grid steps with a partial boundary block.
    for B in (8, 13, 40):
        x = jax.random.normal(jax.random.fold_in(k_x, B), (B, D), dtype=jnp.float32)
        u, log_det = fwd(x, tri1, tri2, b)
        u = jax.block_until_ready(u)
        log_det = jax.block_until_ready(log_det)

        u_ref, ld_ref = _reference(x, tri1, tri2, b)
        assert u.shape == (B, D), (B, u.shape)
        assert log_det.shape == (1,), log_det.shape
        assert jnp.allclose(u, u_ref, atol=1e-4, rtol=1e-4), (
            B, float(jnp.max(jnp.abs(u - u_ref))))
        assert jnp.allclose(log_det, ld_ref, atol=1e-5, rtol=1e-5)

    print("KERNEL_OK")
</pallas_src>

<mosaic_0001>
module attributes {stable_mosaic.version = 11 : i64} {
  func.func @_linear_kernel(%arg0: i32, %arg1: memref<2x128xf32, #tpu.memory_space<vmem>>, %arg2: memref<128x128xf32, #tpu.memory_space<vmem>>, %arg3: memref<1x128xf32, #tpu.memory_space<vmem>>, %arg4: memref<2x128xf32, #tpu.memory_space<vmem>>) attributes {dimension_semantics = [#tpu.dimension_semantics<parallel>], iteration_bounds = array<i64: 1>, scalar_prefetch = 0 : i64, scratch_operands = 0 : i64, tpu.core_type = #tpu.core_type<tc>, window_params = [{transform_indices = @transform_0, window_bounds = array<i64: 2, 128>}, {pipeline_mode = #tpu.pipeline_mode<synchronous>, transform_indices = @transform_1, window_bounds = array<i64: 128, 128>}, {pipeline_mode = #tpu.pipeline_mode<synchronous>, transform_indices = @transform_2, window_bounds = array<i64: 1, 128>}, {transform_indices = @transform_3, window_bounds = array<i64: 2, 128>}]} {
    %c0 = arith.constant 0 : index
    %c0_0 = arith.constant 0 : index
    %0 = vector.load %arg1[%c0, %c0_0] : memref<2x128xf32, #tpu.memory_space<vmem>>, vector<2x128xf32>
    %c0_1 = arith.constant 0 : index
    %c0_2 = arith.constant 0 : index
    %1 = vector.load %arg2[%c0_1, %c0_2] : memref<128x128xf32, #tpu.memory_space<vmem>>, vector<128x128xf32>
    %cst = arith.constant dense<0.000000e+00> : vector<2x128xf32>
    %2 = tpu.matmul %0, %1, %cst {dimension_numbers = #tpu.dot_dimension_numbers<[1], [0], [0], [1], [0, 0, 1, 1], [], []>} : vector<2x128xf32>, vector<128x128xf32>, vector<2x128xf32> -> vector<2x128xf32>
    %c0_3 = arith.constant 0 : index
    %c0_4 = arith.constant 0 : index
    %3 = vector.load %arg3[%c0_3, %c0_4] : memref<1x128xf32, #tpu.memory_space<vmem>>, vector<1x128xf32>
    %4 = vector.broadcast %3 : vector<1x128xf32> to vector<2x128xf32>
    %5 = arith.subf %2, %4 : vector<2x128xf32>
    %c0_5 = arith.constant 0 : index
    %c0_6 = arith.constant 0 : index
    %6 = vector.load %arg4[%c0_5, %c0_6] : memref<2x128xf32, #tpu.memory_space<vmem>>, vector<2x128xf32>
    tpu.vector_store %arg4[%c0_5, %c0_6], %5 {strides = array<i32>} : memref<2x128xf32, #tpu.memory_space<vmem>>, vector<2x128xf32>,
    return
  }
  func.func @transform_0(%arg0: i32) -> (i32, i32) {
    %c0_i32 = arith.constant 0 : i32
    %c0_i32_0 = arith.constant 0 : i32
    return %arg0, %c0_i32 : i32, i32
  }
  func.func @transform_1(%arg0: i32) -> (i32, i32) {
    %c0_i32 = arith.constant 0 : i32
    %c0_i32_0 = arith.constant 0 : i32
    %c0_i32_1 = arith.constant 0 : i32
    return %c0_i32, %c0_i32_0 : i32, i32
  }
  func.func @transform_2(%arg0: i32) -> (i32, i32) {
    %c0_i32 = arith.constant 0 : i32
    %c0_i32_0 = arith.constant 0 : i32
    %c0_i32_1 = arith.constant 0 : i32
    return %c0_i32, %c0_i32_0 : i32, i32
  }
  func.func @transform_3(%arg0: i32) -> (i32, i32) {
    %c0_i32 = arith.constant 0 : i32
    %c0_i32_0 = arith.constant 0 : i32
    return %arg0, %c0_i32 : i32, i32
  }
}

</mosaic_0001>

<bundles_post_ra>
// kernel: tile.8
= control target key start
LH: loop header
LB: loop body
LE: loop exit
PB: predicated region body
PF: predicated region fallthrough
CT: control target
= control target key end

     0   :  { %s22_s0 = inlined_call_operand.vmem [shape: f32[32], index: 0, kind: input, shape index: {}]   ;;  %s23_s1 = inlined_call_operand.vmem [shape: f32[4,32], index: 1, kind: output, shape index: {}]  }
   0x1   :  { %v4_v0 = vld [vmem:[%s22_s0] ss:$0 sm:$0xff] }
   0x2   :  { %5 = vst [vmem:[%s23_s1] sm:$0xf] %v4_v0 }

// kernel: tile.9
= control target key start
LH: loop header
LB: loop body
LE: loop exit
PB: predicated region body
PF: predicated region fallthrough
CT: control target
= control target key end

     0   :  { %vm7_vm0 = vcmask 261120   ;;  %s37_s8 = smov 32   ;;  %s38_s9 = smov 64   ;;  %vm13_vm1 = vcmask 1048320   ;;  %vm19_vm2 = vcmask 785920   ;;  %vm25_vm3 = vcmask 523520   ;;  %s55_s0 = inlined_call_operand.vmem [shape: f32[4,32], index: 0, kind: input, shape index: {}]   ;;  %s56_s1 = inlined_call_operand.vmem [shape: f32[1,128], index: 1, kind: output, shape index: {}]  }
   0x1   :  { %v4_v0 = vld [vmem:[%s55_s0] sm:$0xf]  ;;  %s36_s0 = smov 96  }
   0x2   :  { %5 = vst [vmem:[#allocation1] sm:$0xf] %v4_v0 }
   0x9   :  { %v10_v1 = vld [vmem:[#allocation1 + $0x3] sm:$0x1]   ;;  %v22_v2 = vld [vmem:[#allocation1 + $0x1] sm:$0x1]   ;;  %v6_v3 = vld [vmem:[#allocation1] sm:$0x1]  }
   0xa   :  { %11 = vrot.lane.b32.xlu0 %v10_v1, %s36_s0  ;;  %23 = vrot.lane.b32.xlu1 %v22_v2, %s37_s8  ;;  %v16_v4 = vld [vmem:[#allocation1 + $0x2] sm:$0x1]   ;;  %8 = vst.msk [vmem:[#allocation0] sm:$0x1] %vm7_vm0, %v6_v3  }
   0xe   :  { %17 = vrot.lane.b32.xlu0 %v16_v4, %s38_s9 }
  0x7c   :  { %v12_v5 = vpop.permute.xlu0 %11   ;;  %v24_v6 = vpop.permute.xlu1 %23  }
  0x7d   :  { %14 = vst.msk [vmem:[#allocation0] sm:$0x1] %vm13_vm1, %v12_v5  }
  0x80   :  { %v18_v7 = vpop.permute.xlu0 %17  }
  0x81   :  { %20 = vst.msk [vmem:[#allocation0] sm:$0x1] %vm19_vm2, %v18_v7  }
  0x82   :  { %26 = vst.msk [vmem:[#allocation0] sm:$0x1] %vm25_vm3, %v24_v6  }
  0x89   :  { %v30_v8 = vld [vmem:[#allocation0] sm:$0x1] }
  0x8a   :  { %32 = vst [vmem:[%s56_s1] sm:$0x1] %v30_v8 }

// kernel: linear_layer_init_direct.1
= control target key start
LH: loop header
LB: loop body
LE: loop exit
PB: predicated region body
PF: predicated region fallthrough
CT: control target
= control target key end

     0   :  { %v194_v0 = vmov 0.0|0.0   ;;  %vm195_vm0 = vmmov 0   ;;  %v196_v4 = vmov 0.0   ;;  %s274_s1 = inlined_call_operand.vmem [shape: f32[128,128], index: 1, kind: input, shape index: {}]   ;;  %s275_s0 = inlined_call_operand.vmem [shape: f32[2,128], index: 0, kind: input, shape index: {}]   ;;  %s276_s2 = inlined_call_operand.vmem [shape: f32[1,128], index: 2, kind: input, shape index: {}]   ;;  %s277_s3 = inlined_call_operand.vmem [shape: f32[2,128], index: 3, kind: output, shape index: {}]  }
   0x1   :  { %167 = vmatprep.subr.bf16.mxu0 %v194_v0  ;;  %v15_v1 = vld [vmem:[%s274_s1] sm:$0xff]  ;;  %v16_v2 = vld [vmem:[%s274_s1 + $0x8] sm:$0xff]  ;;  %v17_v3 = vld [vmem:[%s274_s1 + $0x10] sm:$0xff]  ;;  %164 = vmatprep.mubr.msk.f32.mxu0 %vm195_vm0, %v196_v4 }
   0x2   :  { %v168_v5 = vpack.c.bf16 %v16_v2, %v15_v1  ;;  %v18_v6 = vld [vmem:[%s274_s1 + $0x18] sm:$0xff]  ;;  %v19_v8 = vld [vmem:[%s274_s1 + $0x20] sm:$0xff]  ;;  %v20_v9 = vld [vmem:[%s274_s1 + $0x28] sm:$0xff] }
   0x3   :  { %v171_v7 = vpack.c.bf16 %v18_v6, %v17_v3  ;;  %v174_v10 = vpack.c.bf16 %v20_v9, %v19_v8  ;;  %v21_v11 = vld [vmem:[%s274_s1 + $0x30] sm:$0xff]  ;;  %v22_v12 = vld [vmem:[%s274_s1 + $0x38] sm:$0xff]  ;;  %v23_v14 = vld [vmem:[%s274_s1 + $0x40] sm:$0xff] }
   0x4   :  { %169 = vmatpush3.bf16.msra.mxu0 %v168_v5  ;;  %v177_v13 = vpack.c.bf16 %v22_v12, %v21_v11  ;;  %v24_v15 = vld [vmem:[%s274_s1 + $0x48] sm:$0xff]  ;;  %v25_v17 = vld [vmem:[%s274_s1 + $0x50] sm:$0xff]  ;;  %v26_v18 = vld [vmem:[%s274_s1 + $0x58] sm:$0xff] }
   0x5   :  { %170 = vmatprep.subr.bf16.mxu0 %v194_v0  ;;  %v180_v16 = vpack.c.bf16 %v24_v15, %v23_v14  ;;  %v183_v19 = vpack.c.bf16 %v26_v18, %v25_v17  ;;  %v27_v20 = vld [vmem:[%s274_s1 + $0x60] sm:$0xff]  ;;  %v28_v21 = vld [vmem:[%s274_s1 + $0x68] sm:$0xff]  ;;  %v29_v23 = vld [vmem:[%s274_s1 + $0x70] sm:$0xff] }
   0x6   :  { %v186_v22 = vpack.c.bf16 %v28_v21, %v27_v20  ;;  %v30_v24 = vld [vmem:[%s274_s1 + $0x78] sm:$0xff]  ;;  %v14_v26 = vld [vmem:[%s275_s0] sm:$0x3] }
   0x7   :  { %v189_v25 = vpack.c.bf16 %v30_v24, %v29_v23  ;;  %v114_v27 = vld [vmem:[%s276_s2] ss:$0 sm:$0xff] }
   0x8   :  { %172 = vmatpush3.bf16.msra.mxu0 %v171_v7 }
   0x9   :  { %173 = vmatprep.subr.bf16.mxu0 %v194_v0 }
   0xc   :  { %175 = vmatpush3.bf16.msra.mxu0 %v174_v10 }
   0xd   :  { %176 = vmatprep.subr.bf16.mxu0 %v194_v0 }
  0x10   :  { %178 = vmatpush3.bf16.msra.mxu0 %v177_v13 }
  0x11   :  { %179 = vmatprep.subr.bf16.mxu0 %v194_v0 }
  0x14   :  { %181 = vmatpush3.bf16.msra.mxu0 %v180_v16 }
  0x15   :  { %182 = vmatprep.subr.bf16.mxu0 %v194_v0 }
  0x18   :  { %184 = vmatpush3.bf16.msra.mxu0 %v183_v19 }
  0x19   :  { %185 = vmatprep.subr.bf16.mxu0 %v194_v0 }
  0x1c   :  { %187 = vmatpush3.bf16.msra.mxu0 %v186_v22 }
  0x1d   :  { %188 = vmatprep.subr.bf16.mxu0 %v194_v0 }
  0x20   :  { %190 = vmatpush3.bf16.msra.mxu0 %v189_v25 }
  0x23   :  { %165 = vmatmul.mubr.f32.vlgmr.msra.gmra.mrb[0].mxu0 %v14_v26 }
  0xf6   :  { %v97_v28 = vpop.f32.mrb[0].mxu0 }
  0xf7   :  { %v108_v29 = vsub.f32 %v97_v28, %v114_v27  ;;  %v166_v30 = vpop.f32.mrb[1].mxu0 }
  0xf9   :  { %109 = vst [vmem:[%s277_s3] sm:$0x3] %v108_v29 }

</bundles_post_ra>
